<compile_context>
chip_gen: v7x
topology: tpu7x:2x2x1
jax: 0.10.0
libtpu: 0.0.40
codegen_flags: <defaults>
</compile_context>

<pallas_src>
import functools

import jax
import jax.numpy as jnp
from jax.experimental import pallas as pl
from jax.experimental.pallas import tpu as pltpu

HIDDEN = 256


def _actor_kernel(max_action, obs_ref, w1_ref, b1_ref, w2_ref, b2_ref,
                  w3_ref, b3_ref, out_ref):
    # obs_ref: (block_b, obs_dim) bf16; weights bf16; biases f32.
    x = obs_ref[...]
    h = jnp.dot(x, w1_ref[...], preferred_element_type=jnp.float32) + b1_ref[...]
    h = jnp.maximum(h, 0.0)                                   # f32 VPU (v5e-safe)
    h = jnp.dot(h.astype(w2_ref.dtype), w2_ref[...],
                preferred_element_type=jnp.float32) + b2_ref[...]
    h = jnp.maximum(h, 0.0)
    a = jnp.dot(h.astype(w3_ref.dtype), w3_ref[...],
                preferred_element_type=jnp.float32) + b3_ref[...]
    out_ref[...] = (max_action * jnp.tanh(a)).astype(out_ref.dtype)


def actor_forward(obs, params, max_action):
    """obs: (B, obs_dim) f32. Returns actions (B, action_dim) f32."""
    w1, b1, w2, b2, w3, b3 = params
    B, obs_dim = obs.shape
    hidden = w1.shape[1]
    action_dim = w3.shape[1]

    # One program per batch tile; weights stay VMEM-resident across tiles.
    block_b = B if B <= 256 else 256
    grid = (pl.cdiv(B, block_b),)

    obs_lp = obs.astype(w1.dtype)  # bf16 activations into the MXU

    kernel = functools.partial(_actor_kernel, float(max_action))

    return pl.pallas_call(
        kernel,
        out_shape=jax.ShapeDtypeStruct((B, action_dim), jnp.float32),
        grid_spec=pltpu.PrefetchScalarGridSpec(
            num_scalar_prefetch=0,
            grid=grid,
            in_specs=[
                pl.BlockSpec((block_b, obs_dim), lambda i: (i, 0)),   # obs tile
                pl.BlockSpec((obs_dim, hidden), lambda i: (0, 0)),    # w1 resident
                pl.BlockSpec((1, hidden), lambda i: (0, 0)),          # b1
                pl.BlockSpec((hidden, hidden), lambda i: (0, 0)),     # w2 resident
                pl.BlockSpec((1, hidden), lambda i: (0, 0)),          # b2
                pl.BlockSpec((hidden, action_dim), lambda i: (0, 0)), # w3 resident
                pl.BlockSpec((1, action_dim), lambda i: (0, 0)),      # b3
            ],
            out_specs=pl.BlockSpec((block_b, action_dim), lambda i: (i, 0)),
        ),
        compiler_params=pltpu.CompilerParams(
            dimension_semantics=("parallel",)),
    )(obs_lp, w1, b1, w2, b2, w3, b3)


def init_actor_params(key, obs_dim, action_dim, hidden=HIDDEN,
                      w_dtype=jnp.bfloat16):
    """torch.nn.Linear-style init (uniform +/- 1/sqrt(fan_in)).
    Weights stored (in, out) in bf16; biases (1, out) in f32."""
    keys = jax.random.split(key, 6)

    def lin(kw, kb, fan_in, fan_out):
        bound = 1.0 / jnp.sqrt(jnp.float32(fan_in))
        w = jax.random.uniform(kw, (fan_in, fan_out), jnp.float32, -bound, bound)
        b = jax.random.uniform(kb, (1, fan_out), jnp.float32, -bound, bound)
        return w.astype(w_dtype), b

    w1, b1 = lin(keys[0], keys[1], obs_dim, hidden)
    w2, b2 = lin(keys[2], keys[3], hidden, hidden)
    w3, b3 = lin(keys[4], keys[5], hidden, action_dim)
    return (w1, b1, w2, b2, w3, b3)


def actor_ref(obs, params, max_action):
    # Pure-JAX reference mirroring the kernel's bf16 input casts.
    w1, b1, w2, b2, w3, b3 = params
    x = obs.astype(w1.dtype).astype(jnp.float32)
    w1f, w2f, w3f = (w.astype(jnp.float32) for w in (w1, w2, w3))
    h = jnp.maximum(x @ w1f + b1, 0.0)
    h = jnp.maximum(h.astype(w2.dtype).astype(jnp.float32) @ w2f + b2, 0.0)
    a = h.astype(w3.dtype).astype(jnp.float32) @ w3f + b3
    return max_action * jnp.tanh(a)


if __name__ == "__main__":
    key = jax.random.PRNGKey(0)
    k_obs, k_params = jax.random.split(key, 2)

    batch, obs_dim, action_dim = 8, 12, 4
    max_action = 2.0

    obs = jax.random.normal(k_obs, (batch, obs_dim), jnp.float32)
    params = init_actor_params(k_params, obs_dim, action_dim)

    act = actor_forward(obs, params, max_action)
    jax.block_until_ready(act)

    ref = actor_ref(obs, params, max_action)
    assert act.shape == (batch, action_dim)
    assert jnp.allclose(act, ref, atol=1e-2, rtol=1e-2)
    assert bool(jnp.all(jnp.abs(act) <= max_action + 1e-5))

    print("KERNEL_OK")
</pallas_src>

<mosaic_0001>
module attributes {stable_mosaic.version = 11 : i64} {
  func.func @_actor_kernel(%arg0: i32, %arg1: memref<8x12xbf16, #tpu.memory_space<vmem>>, %arg2: memref<12x256xbf16, #tpu.memory_space<vmem>>, %arg3: memref<1x256xf32, #tpu.memory_space<vmem>>, %arg4: memref<256x256xbf16, #tpu.memory_space<vmem>>, %arg5: memref<1x256xf32, #tpu.memory_space<vmem>>, %arg6: memref<256x4xbf16, #tpu.memory_space<vmem>>, %arg7: memref<1x4xf32, #tpu.memory_space<vmem>>, %arg8: memref<8x4xf32, #tpu.memory_space<vmem>>) attributes {dimension_semantics = [#tpu.dimension_semantics<parallel>], iteration_bounds = array<i64: 1>, scalar_prefetch = 0 : i64, scratch_operands = 0 : i64, tpu.core_type = #tpu.core_type<tc>, window_params = [{transform_indices = @transform_0, window_bounds = array<i64: 8, 12>}, {pipeline_mode = #tpu.pipeline_mode<synchronous>, transform_indices = @transform_1, window_bounds = array<i64: 12, 256>}, {pipeline_mode = #tpu.pipeline_mode<synchronous>, transform_indices = @transform_2, window_bounds = array<i64: 1, 256>}, {pipeline_mode = #tpu.pipeline_mode<synchronous>, transform_indices = @transform_3, window_bounds = array<i64: 256, 256>}, {pipeline_mode = #tpu.pipeline_mode<synchronous>, transform_indices = @transform_4, window_bounds = array<i64: 1, 256>}, {pipeline_mode = #tpu.pipeline_mode<synchronous>, transform_indices = @transform_5, window_bounds = array<i64: 256, 4>}, {pipeline_mode = #tpu.pipeline_mode<synchronous>, transform_indices = @transform_6, window_bounds = array<i64: 1, 4>}, {transform_indices = @transform_7, window_bounds = array<i64: 8, 4>}]} {
    %c0 = arith.constant 0 : index
    %c0_0 = arith.constant 0 : index
    %0 = vector.load %arg1[%c0, %c0_0] : memref<8x12xbf16, #tpu.memory_space<vmem>>, vector<8x12xbf16>
    %c0_1 = arith.constant 0 : index
    %c0_2 = arith.constant 0 : index
    %1 = vector.load %arg2[%c0_1, %c0_2] : memref<12x256xbf16, #tpu.memory_space<vmem>>, vector<12x256xbf16>
    %cst = arith.constant dense<0.000000e+00> : vector<8x256xf32>
    %2 = tpu.matmul %0, %1, %cst {dimension_numbers = #tpu.dot_dimension_numbers<[1], [0], [0], [1], [0, 0, 1, 1], [], []>} : vector<8x12xbf16>, vector<12x256xbf16>, vector<8x256xf32> -> vector<8x256xf32>
    %c0_3 = arith.constant 0 : index
    %c0_4 = arith.constant 0 : index
    %3 = vector.load %arg3[%c0_3, %c0_4] : memref<1x256xf32, #tpu.memory_space<vmem>>, vector<1x256xf32>
    %4 = vector.broadcast %3 : vector<1x256xf32> to vector<8x256xf32>
    %5 = arith.addf %2, %4 : vector<8x256xf32>
    %cst_5 = arith.constant 0.000000e+00 : f32
    %6 = vector.broadcast %cst_5 : f32 to vector<8x256xf32>
    %7 = arith.maximumf %5, %6 : vector<8x256xf32>
    %8 = arith.truncf %7 : vector<8x256xf32> to vector<8x256xbf16>
    %c0_6 = arith.constant 0 : index
    %c0_7 = arith.constant 0 : index
    %9 = vector.load %arg4[%c0_6, %c0_7] : memref<256x256xbf16, #tpu.memory_space<vmem>>, vector<256x256xbf16>
    %cst_8 = arith.constant dense<0.000000e+00> : vector<8x256xf32>
    %10 = tpu.matmul %8, %9, %cst_8 {dimension_numbers = #tpu.dot_dimension_numbers<[1], [0], [0], [1], [0, 0, 1, 1], [], []>} : vector<8x256xbf16>, vector<256x256xbf16>, vector<8x256xf32> -> vector<8x256xf32>
    %c0_9 = arith.constant 0 : index
    %c0_10 = arith.constant 0 : index
    %11 = vector.load %arg5[%c0_9, %c0_10] : memref<1x256xf32, #tpu.memory_space<vmem>>, vector<1x256xf32>
    %12 = vector.broadcast %11 : vector<1x256xf32> to vector<8x256xf32>
    %13 = arith.addf %10, %12 : vector<8x256xf32>
    %cst_11 = arith.constant 0.000000e+00 : f32
    %14 = vector.broadcast %cst_11 : f32 to vector<8x256xf32>
    %15 = arith.maximumf %13, %14 : vector<8x256xf32>
    %16 = arith.truncf %15 : vector<8x256xf32> to vector<8x256xbf16>
    %c0_12 = arith.constant 0 : index
    %c0_13 = arith.constant 0 : index
    %17 = vector.load %arg6[%c0_12, %c0_13] : memref<256x4xbf16, #tpu.memory_space<vmem>>, vector<256x4xbf16>
    %cst_14 = arith.constant dense<0.000000e+00> : vector<8x4xf32>
    %18 = tpu.matmul %16, %17, %cst_14 {dimension_numbers = #tpu.dot_dimension_numbers<[1], [0], [0], [1], [0, 0, 1, 1], [], []>} : vector<8x256xbf16>, vector<256x4xbf16>, vector<8x4xf32> -> vector<8x4xf32>
    %c0_15 = arith.constant 0 : index
    %c0_16 = arith.constant 0 : index
    %19 = vector.load %arg7[%c0_15, %c0_16] : memref<1x4xf32, #tpu.memory_space<vmem>>, vector<1x4xf32>
    %20 = vector.broadcast %19 : vector<1x4xf32> to vector<8x4xf32>
    %21 = arith.addf %18, %20 : vector<8x4xf32>
    %22 = math.tanh %21 : vector<8x4xf32>
    %cst_17 = arith.constant 2.000000e+00 : f32
    %23 = vector.broadcast %cst_17 : f32 to vector<8x4xf32>
    %24 = arith.mulf %23, %22 : vector<8x4xf32>
    %c0_18 = arith.constant 0 : index
    %c0_19 = arith.constant 0 : index
    %25 = vector.load %arg8[%c0_18, %c0_19] : memref<8x4xf32, #tpu.memory_space<vmem>>, vector<8x4xf32>
    tpu.vector_store %arg8[%c0_18, %c0_19], %24 {strides = array<i32>} : memref<8x4xf32, #tpu.memory_space<vmem>>, vector<8x4xf32>,
    return
  }
  func.func @transform_0(%arg0: i32) -> (i32, i32) {
    %c0_i32 = arith.constant 0 : i32
    %c0_i32_0 = arith.constant 0 : i32
    return %arg0, %c0_i32 : i32, i32
  }
  func.func @transform_1(%arg0: i32) -> (i32, i32) {
    %c0_i32 = arith.constant 0 : i32
    %c0_i32_0 = arith.constant 0 : i32
    %c0_i32_1 = arith.constant 0 : i32
    return %c0_i32, %c0_i32_0 : i32, i32
  }
  func.func @transform_2(%arg0: i32) -> (i32, i32) {
    %c0_i32 = arith.constant 0 : i32
    %c0_i32_0 = arith.constant 0 : i32
    %c0_i32_1 = arith.constant 0 : i32
    return %c0_i32, %c0_i32_0 : i32, i32
  }
  func.func @transform_3(%arg0: i32) -> (i32, i32) {
    %c0_i32 = arith.constant 0 : i32
    %c0_i32_0 = arith.constant 0 : i32
    %c0_i32_1 = arith.constant 0 : i32
    return %c0_i32, %c0_i32_0 : i32, i32
  }
  func.func @transform_4(%arg0: i32) -> (i32, i32) {
    %c0_i32 = arith.constant 0 : i32
    %c0_i32_0 = arith.constant 0 : i32
    %c0_i32_1 = arith.constant 0 : i32
    return %c0_i32, %c0_i32_0 : i32, i32
  }
  func.func @transform_5(%arg0: i32) -> (i32, i32) {
    %c0_i32 = arith.constant 0 : i32
    %c0_i32_0 = arith.constant 0 : i32
    %c0_i32_1 = arith.constant 0 : i32
    return %c0_i32, %c0_i32_0 : i32, i32
  }
  func.func @transform_6(%arg0: i32) -> (i32, i32) {
    %c0_i32 = arith.constant 0 : i32
    %c0_i32_0 = arith.constant 0 : i32
    %c0_i32_1 = arith.constant 0 : i32
    return %c0_i32, %c0_i32_0 : i32, i32
  }
  func.func @transform_7(%arg0: i32) -> (i32, i32) {
    %c0_i32 = arith.constant 0 : i32
    %c0_i32_0 = arith.constant 0 : i32
    return %arg0, %c0_i32 : i32, i32
  }
}

</mosaic_0001>

<bundles_post_ra>
// kernel: tpu_custom_call.1
= control target key start
LH: loop header
LB: loop body
LE: loop exit
PB: predicated region body
PF: predicated region fallthrough
CT: control target
= control target key end

     0   :  { %12 = vsyncpa [#allocation3], 0  ;;  %s725_s24 = smov [#allocation2]   ;;  %s850_s0 = inlined_call_operand.vmem [shape: bf16[8,12], index: 0, kind: input, shape index: {}]   ;;  %s851_s1 = inlined_call_operand.vmem [shape: bf16[12,256], index: 1, kind: input, shape index: {}]   ;;  %s852_s2 = inlined_call_operand.vmem [shape: f32[1,256], index: 2, kind: input, shape index: {}]   ;;  %s853_s3 = inlined_call_operand.hbm [shape: bf16[256,256], index: 3, kind: input, shape index: {}]   ;;  %s854_s4 = inlined_call_operand.vmem [shape: f32[1,256], index: 4, kind: input, shape index: {}]   ;;  %s855_s5 = inlined_call_operand.vmem [shape: bf16[256,4], index: 5, kind: input, shape index: {}]   ;;  %s856_s6 = inlined_call_operand.vmem [shape: f32[1,4], index: 6, kind: input, shape index: {}]   ;;  %s857_s7 = inlined_call_operand.vmem [shape: f32[8,4], index: 7, kind: output, shape index: {}]  }
   0x1   :  { %s24_s25 = sshll.u32 %s725_s24, 4  ;;  %s701_s28 = scalar_lea.hbm %s853_s3, 4096  ;;  %s25_s25 = int_to_ptr.vmem [resolvable:$true] %s24_s25 }
   0x2   :  { %p702_p0 = scmp.ne.s32.totalorder %s853_s3, %s701_s28  ;;  %p705_p1 = scmp.lt.u32.totalorder %s701_s28, %s853_s3 }
   0x4   :  { %p707_p2 = pnand %p705_p1, %p702_p0 }
   0x6   :  { %710 = shalt.err (!%p707_p2)
}
   0x7   :  { %s711_s10 = scalar_lea.vmem %s25_s25, 4096  ;;  %p716_p4 = scmp.lt.s32.totalorder %s25_s25, %s25_s25 }
   0x8   :  { %p712_p3 = scmp.ne.s32.totalorder %s25_s25, %s711_s10  ;;  %p717_p5 = scmp.lt.s32.totalorder %s711_s10, %s711_s10 }
   0xa   :  { %p718_p6 = por %p717_p5, %p716_p4 }
   0xc   :  { %p719_p7 = pnand %p718_p6, %p712_p3 }
   0xe   :  { %722 = shalt.err (!%p719_p7)
}
   0xf   :  { %s726_s11 = smov 128   ;;  %s727_s12 = smov 8  }
  0x10   :  { %30 = dma.hbm_to_vmem [thread:$0]  %s853_s3, 4096, %s25_s25, [#allocation3], %s726_s11, %s726_s11, %s727_s12  }
  0x11   :  { %723 = dma.done.wait [#allocation3], 4096  }
  0x12   :  { %724 = vsyncadd [#allocation3], 4294963200  ;;  %v728_v0 = vmov 0   ;;  %vm68_vm0 = vcmask 1045504   ;;  %v635_v3 = vld [vmem:[#allocation2 + $0x4] ss:$8 sps:$4 sm:$0xff]   ;;  %v46_v49 = vlaneseq }
  0x13   :  { %107 = vmatprep.mubr.bf16.mxu0 %v728_v0  ;;  %v632_v1 = vld [vmem:[%s851_s1 + $0x4] ss:$8 sps:$4 sm:$0x3f]   ;;  %v634_v2 = vld [vmem:[%s851_s1] ss:$8 sps:$4 sm:$0x3f]   ;;  %324 = vmatprep.subr.bf16.mxu1 %v635_v3 }
  0x14   :  { %555 = vmatprep.subr.msk.bf16.mxu0 %vm68_vm0, %v632_v1  ;;  %v637_v4 = vld [vmem:[#allocation2] ss:$8 sps:$4 sm:$0xff]   ;;  %v70_v5 = vsel %vm68_vm0, %v634_v2, 0  ;;  %v638_v6 = vld [vmem:[#allocation2 + $0x14] ss:$8 sps:$4 sm:$0xff]   ;;  %vm64_vm1 = vcmask 97280  }
  0x15   :  { %76 = vmatpush1.bf16.msra.mxu0 %v70_v5  ;;  %v41_v7 = vld [vmem:[%s850_s0] sm:$0xf]  ;;  %325 = vmatpush1.bf16.msra.mxu1 %v637_v4  ;;  %v640_v8 = vld [vmem:[#allocation2 + $0x10] ss:$8 sps:$4 sm:$0xff]   ;;  %v641_v9 = vld [vmem:[#allocation2 + $0x24] ss:$8 sps:$4 sm:$0xff]  }
  0x16   :  { %326 = vmatprep.subr.bf16.mxu1 %v638_v6  ;;  %v643_v10 = vld [vmem:[#allocation2 + $0x20] ss:$8 sps:$4 sm:$0xff]   ;;  %v644_v11 = vld [vmem:[#allocation2 + $0x34] ss:$8 sps:$4 sm:$0xff]   ;;  %v646_v12 = vld [vmem:[#allocation2 + $0x30] ss:$8 sps:$4 sm:$0xff]  }
  0x17   :  { %v647_v13 = vld [vmem:[#allocation2 + $0x44] ss:$8 sps:$4 sm:$0xff]   ;;  %v649_v14 = vld [vmem:[#allocation2 + $0x40] ss:$8 sps:$4 sm:$0xff]   ;;  %v650_v15 = vld [vmem:[#allocation2 + $0x54] ss:$8 sps:$4 sm:$0xff]  }
  0x18   :  { %556 = vmatmul.mubr.msk.bf16.vlgmr.msra.gmra.mrb[0].mxu0 %vm64_vm1, %v41_v7  ;;  %v652_v16 = vld [vmem:[#allocation2 + $0x50] ss:$8 sps:$4 sm:$0xff]   ;;  %v653_v17 = vld [vmem:[#allocation2 + $0x64] ss:$8 sps:$4 sm:$0xff]   ;;  %v655_v18 = vld [vmem:[#allocation2 + $0x60] ss:$8 sps:$4 sm:$0xff]  }
  0x19   :  { %327 = vmatpush1.bf16.msra.mxu1 %v640_v8  ;;  %v656_v19 = vld [vmem:[#allocation2 + $0x74] ss:$8 sps:$4 sm:$0xff]   ;;  %v658_v20 = vld [vmem:[#allocation2 + $0x70] ss:$8 sps:$4 sm:$0xff]   ;;  %v659_v21 = vld [vmem:[#allocation2 + $0x84] ss:$8 sps:$4 sm:$0xff]  }
  0x1a   :  { %328 = vmatprep.subr.bf16.mxu1 %v641_v9  ;;  %v661_v22 = vld [vmem:[#allocation2 + $0x80] ss:$8 sps:$4 sm:$0xff]   ;;  %v662_v23 = vld [vmem:[#allocation2 + $0x94] ss:$8 sps:$4 sm:$0xff]   ;;  %v664_v24 = vld [vmem:[#allocation2 + $0x90] ss:$8 sps:$4 sm:$0xff]  }
  0x1b   :  { %v665_v25 = vld [vmem:[#allocation2 + $0xa4] ss:$8 sps:$4 sm:$0xff]   ;;  %v667_v26 = vld [vmem:[#allocation2 + $0xa0] ss:$8 sps:$4 sm:$0xff]   ;;  %v668_v27 = vld [vmem:[#allocation2 + $0xb4] ss:$8 sps:$4 sm:$0xff]  }
  0x1c   :  { %v670_v28 = vld [vmem:[#allocation2 + $0xb0] ss:$8 sps:$4 sm:$0xff]   ;;  %v671_v29 = vld [vmem:[#allocation2 + $0xc4] ss:$8 sps:$4 sm:$0xff]   ;;  %v673_v30 = vld [vmem:[#allocation2 + $0xc0] ss:$8 sps:$4 sm:$0xff]  }
  0x1d   :  { %329 = vmatpush1.bf16.msra.mxu1 %v643_v10  ;;  %v674_v31 = vld [vmem:[#allocation2 + $0xd4] ss:$8 sps:$4 sm:$0xff]   ;;  %v676_v32 = vld [vmem:[#allocation2 + $0xd0] ss:$8 sps:$4 sm:$0xff]   ;;  %v677_v33 = vld [vmem:[#allocation2 + $0xe4] ss:$8 sps:$4 sm:$0xff]  }
  0x1e   :  { %330 = vmatprep.subr.bf16.mxu1 %v644_v11  ;;  %v679_v34 = vld [vmem:[#allocation2 + $0xe0] ss:$8 sps:$4 sm:$0xff]   ;;  %v680_v35 = vld [vmem:[#allocation2 + $0xf4] ss:$8 sps:$4 sm:$0xff]   ;;  %v682_v36 = vld [vmem:[#allocation2 + $0xf0] ss:$8 sps:$4 sm:$0xff]  }
  0x1f   :  { %v683_v37 = vld [vmem:[%s855_s5 + $0x40] sm:$0xff]   ;;  %v685_v39 = vld [vmem:[%s855_s5 + $0x48] sm:$0xff]   ;;  %v687_v41 = vld [vmem:[%s855_s5 + $0x50] sm:$0xff]   ;;  %v47_v50 = vshrl.u32 %v46_v49, 7  ;;  %vm546_vm2 = vcmask 31744  }
  0x20   :  { %v684_v38 = vld [vmem:[%s855_s5] sm:$0xff]   ;;  %606 = vmatprep.subr.bf16.mxu0 %v683_v37  ;;  %v686_v40 = vld [vmem:[%s855_s5 + $0x8] sm:$0xff]   ;;  %v688_v42 = vld [vmem:[%s855_s5 + $0x10] sm:$0xff]  }
  0x21   :  { %331 = vmatpush1.bf16.msra.mxu1 %v646_v12  ;;  %607 = vmatpush3.bf16.msra.mxu0 %v684_v38  ;;  %v689_v43 = vld [vmem:[%s855_s5 + $0x58] sm:$0xff]   ;;  %v691_v45 = vld [vmem:[%s855_s5 + $0x60] sm:$0xff]   ;;  %v693_v47 = vld [vmem:[%s855_s5 + $0x68] sm:$0xff]   ;;  %v48_v51 = vsub.s32 0, %v47_v50  ;;  %v52_v53 = vsub.s32 1, %v47_v50 }
  0x22   :  { %332 = vmatprep.subr.bf16.mxu1 %v647_v13  ;;  %608 = vmatprep.subr.bf16.mxu0 %v685_v39  ;;  %v690_v44 = vld [vmem:[%s855_s5 + $0x18] sm:$0xff]   ;;  %v692_v46 = vld [vmem:[%s855_s5 + $0x20] sm:$0xff]   ;;  %v694_v48 = vld [vmem:[%s855_s5 + $0x28] sm:$0xff]  }
  0x23   :  { %v44_v52 = vld [vmem:[%s852_s2] sm:$0x3]  ;;  %v695_v2 = vld [vmem:[%s855_s5 + $0x70] sm:$0xff]   ;;  %v697_v4 = vld [vmem:[%s855_s5 + $0x78] sm:$0xff]  }
  0x24   :  { %v49_v54 = vrot.slane %v44_v52, %v48_v51  ;;  %v53_v55 = vrot.slane %v44_v52, %v52_v53  ;;  %v696_v3 = vld [vmem:[%s855_s5 + $0x30] sm:$0xff]   ;;  %v698_v5 = vld [vmem:[%s855_s5 + $0x38] sm:$0xff]   ;;  %v152_v6 = vld [vmem:[%s854_s4] sm:$0x3] }
  0x25   :  { %333 = vmatpush1.bf16.msra.mxu1 %v649_v14  ;;  %609 = vmatpush3.bf16.msra.mxu0 %v686_v40  ;;  %v157_v7 = vrot.slane %v152_v6, %v48_v51  ;;  %v161_v8 = vrot.slane %v152_v6, %v52_v53 }
  0x26   :  { %334 = vmatprep.subr.bf16.mxu1 %v650_v15  ;;  %610 = vmatprep.subr.bf16.mxu0 %v687_v41 }
  0x29   :  { %335 = vmatpush1.bf16.msra.mxu1 %v652_v16  ;;  %611 = vmatpush3.bf16.msra.mxu0 %v688_v42 }
  0x2a   :  { %336 = vmatprep.subr.bf16.mxu1 %v653_v17  ;;  %612 = vmatprep.subr.bf16.mxu0 %v689_v43 }
  0x2d   :  { %337 = vmatpush1.bf16.msra.mxu1 %v655_v18  ;;  %613 = vmatpush3.bf16.msra.mxu0 %v690_v44 }
  0x2e   :  { %338 = vmatprep.subr.bf16.mxu1 %v656_v19  ;;  %614 = vmatprep.subr.bf16.mxu0 %v691_v45 }
  0x31   :  { %339 = vmatpush1.bf16.msra.mxu1 %v658_v20  ;;  %615 = vmatpush3.bf16.msra.mxu0 %v692_v46  ;;  %v589_v20 = vld [vmem:[%s856_s6] ss:$0 sm:$0xff] }
  0x32   :  { %340 = vmatprep.subr.bf16.mxu1 %v659_v21  ;;  %616 = vmatprep.subr.bf16.mxu0 %v693_v47 }
  0x35   :  { %341 = vmatpush1.bf16.msra.mxu1 %v661_v22  ;;  %617 = vmatpush3.bf16.msra.mxu0 %v694_v48 }
  0x36   :  { %342 = vmatprep.subr.bf16.mxu1 %v662_v23  ;;  %618 = vmatprep.subr.bf16.mxu0 %v695_v2 }
  0x39   :  { %343 = vmatpush1.bf16.msra.mxu1 %v664_v24  ;;  %619 = vmatpush3.bf16.msra.mxu0 %v696_v3 }
  0x3a   :  { %344 = vmatprep.subr.bf16.mxu1 %v665_v25  ;;  %620 = vmatprep.subr.bf16.mxu0 %v697_v4 }
  0x3d   :  { %345 = vmatpush1.bf16.msra.mxu1 %v667_v26  ;;  %621 = vmatpush3.bf16.msra.mxu0 %v698_v5 }
  0x3e   :  { %346 = vmatprep.subr.bf16.mxu1 %v668_v27 }
  0x41   :  { %347 = vmatpush1.bf16.msra.mxu1 %v670_v28 }
  0x42   :  { %348 = vmatprep.subr.bf16.mxu1 %v671_v29 }
  0x45   :  { %349 = vmatpush1.bf16.msra.mxu1 %v673_v30 }
  0x46   :  { %350 = vmatprep.subr.bf16.mxu1 %v674_v31 }
  0x49   :  { %351 = vmatpush1.bf16.msra.mxu1 %v676_v32 }
  0x4a   :  { %352 = vmatprep.subr.bf16.mxu1 %v677_v33 }
  0x4d   :  { %353 = vmatpush1.bf16.msra.mxu1 %v679_v34 }
  0x4e   :  { %354 = vmatprep.subr.bf16.mxu1 %v680_v35 }
  0x51   :  { %355 = vmatpush1.bf16.msra.mxu1 %v682_v36 }
  0xeb   :  { %v109_v56 = vpop.f32.mrb[0].mxu0 }
  0xec   :  { %v110_v57 = vadd.f32 %v109_v56, %v49_v54  ;;  %v111_v58 = vpop.f32.mrb[1].mxu0 }
  0xed   :  { %v112_v59 = vadd.f32 %v111_v58, %v53_v55  ;;  %v113_v60 = vpop.f32.mrb[2].mxu0 }
  0xee   :  { %v116_v61 = vmax.f32 %v110_v57, 0.0  ;;  %v114_v62 = vpop.f32.mrb[3].mxu0 }
  0xef   :  { %v117_v63 = vmax.f32 %v112_v59, 0.0 }
  0xf0   :  { %v118_v1 = vpack.c.bf16 %v116_v61, %v116_v61 }
  0xf1   :  { %v119_v0 = vpack.c.bf16 %v117_v63, %v117_v63 }
  0xf3   :  { %356 = vmatprep.mubr.bf16.mxu1 %v119_v0 }
  0xf4   :  { %357 = vmatmul.mubr.bf16.vlgmr.msra.gmra.mrb[0].mxu1 %v118_v1 }
 0x1c7   :  { %v358_v9 = vpop.f32.mrb[0].mxu1 }
 0x1c8   :  { %v359_v10 = vadd.f32 %v358_v9, %v157_v7  ;;  %v360_v11 = vpop.f32.mrb[1].mxu1 }
 0x1c9   :  { %v361_v12 = vadd.f32 %v360_v11, %v161_v8  ;;  %v362_v13 = vpop.f32.mrb[2].mxu1 }
 0x1ca   :  { %v365_v14 = vmax.f32 %v359_v10, 0.0  ;;  %v363_v15 = vpop.f32.mrb[3].mxu1 }
 0x1cb   :  { %v366_v16 = vmax.f32 %v361_v12, 0.0 }
 0x1cc   :  { %v367_v18 = vpack.c.bf16 %v365_v14, %v365_v14 }
 0x1cd   :  { %v368_v17 = vpack.c.bf16 %v366_v16, %v366_v16 }
 0x1cf   :  { %536 = vmatprep.mubr.bf16.mxu0 %v368_v17 }
 0x1d0   :  { %537 = vmatmul.mubr.bf16.vlgmr.msra.gmra.mrb[4].mxu0 %v367_v18 }
 0x2a3   :  { %v622_v19 = vpop.f32.mrb[4].mxu0 }
 0x2a4   :  { %v623_v21 = vpop.f32.mrb[5].mxu0 }
 0x2a5   :  { %v624_v22 = vadd.f32 %v623_v21, %v622_v19  ;;  %v625_v23 = vpop.f32.mrb[6].mxu0 }
 0x2a6   :  { %v626_v24 = vpop.f32.mrb[7].mxu0 }
 0x2a7   :  { %v539_v25 = vadd.f32 %v624_v22, %v589_v20 }
 0x2a9   :  { %699 = vtanh.f32 %v539_v25 }
 0x2b3   :  { %v700_v26 = vpop.eup %699 }
 0x2b4   :  { %v545_v27 = vmul.f32 2.0, %v700_v26 }
 0x2b6   :  { %547 = vst.msk [vmem:[%s857_s7] sm:$0xff] %vm546_vm2, %v545_v27 }
 0x2b7   :  { %552 = vsyncpa [#allocation3], 1 }

</bundles_post_ra>
